<compile_context>
chip_gen: v7x
topology: tpu7x:2x2x1
jax: 0.10.0
libtpu: 0.0.40
codegen_flags: <defaults>
</compile_context>

<pallas_src>
import functools

import jax
import jax.numpy as jnp
from jax import lax
from jax.experimental import pallas as pl
from jax.experimental.pallas import tpu as pltpu


def _translate_y_kernel(ty_ref, x_ref, o_ref, *, H, W):
    # ty_ref: (1,) int32 scalar-prefetch (SMEM).
    # x_ref / o_ref: (B, H*W) VMEM tiles (planes flattened, lane-dense).
    L = H * W
    ty = ty_ref[0]                      # vertical shift in rows (+ = down)
    shift = ty * W                      # same shift on the flattened H*W axis

    # Non-negative rotation amount (rotation by shift mod L is equivalent).
    rot = lax.rem(lax.rem(shift, L) + L, L)

    x = x_ref[...]                                         # (B, L)
    rolled = pltpu.roll(x, rot, axis=1)                    # XLU lane rotation
    col = lax.broadcasted_iota(jnp.int32, x.shape, 1)      # flattened index
    src = col - shift                                      # source index
    valid = jnp.logical_and(src >= 0, src < L)             # zero-fill mask
    o_ref[...] = jnp.where(valid, rolled, jnp.zeros_like(rolled))


def _pick_block_rows(P, L, itemsize, target_bytes=2 << 20):
    """Choose B (planes per grid step) so each block is ~2 MiB and the block's
    second-to-last dim is divisible by 8 (or equals the full extent)."""
    row_bytes = max(L * itemsize, 1)
    b = max(1, target_bytes // row_bytes)
    b = min(b, P)
    if P >= 8:
        b = max(8, (b // 8) * 8)
        # Prefer >= 2 grid steps so v7x's 2 TensorCores both get work.
        if b >= P and P >= 16:
            b = max(8, ((P // 2) // 8) * 8)
    else:
        b = P          # block dim == full array dim is always allowed
    return b


def translate_y(x, ty):
    """x: (N, C, H, W); ty: scalar int32 vertical shift (positive = down)."""
    N, C, H, W = x.shape
    P, L = N * C, H * W
    x2 = x.reshape(P, L)                              # free reshape, lane-dense
    ty_arr = jnp.asarray(ty, dtype=jnp.int32).reshape((1,))

    B = _pick_block_rows(P, L, x.dtype.itemsize)
    grid = (pl.cdiv(P, B),)

    kernel = functools.partial(_translate_y_kernel, H=H, W=W)
    out = pl.pallas_call(
        kernel,
        out_shape=jax.ShapeDtypeStruct((P, L), x.dtype),
        grid_spec=pltpu.PrefetchScalarGridSpec(
            num_scalar_prefetch=1,
            grid=grid,
            # index_maps receive the scalar-prefetch ref as a trailing arg
            in_specs=[pl.BlockSpec((B, L), lambda i, ty_ref: (i, 0))],
            out_specs=pl.BlockSpec((B, L), lambda i, ty_ref: (i, 0)),
        ),
        compiler_params=pltpu.CompilerParams(
            dimension_semantics=("parallel",)),
    )(ty_arr, x2)
    return out.reshape(N, C, H, W)


def sample_ty(key, height, max_frac=0.45):
    """RandomAffine.get_params: ty = round(Uniform(-max_frac*H, max_frac*H)).
    (Same transform applied to the whole batch, as torchvision does.)"""
    max_dy = max_frac * height
    dy = jax.random.uniform(key, (), minval=-max_dy, maxval=max_dy)
    return jnp.round(dy).astype(jnp.int32)


if __name__ == "__main__":
    key = jax.random.PRNGKey(0)
    k_img, k_t = jax.random.split(key)

    # small shapes consistent with an NCHW image batch
    N, C, H, W = 2, 4, 16, 16
    x = jax.random.normal(k_img, (N, C, H, W), dtype=jnp.float32)
    ty = sample_ty(k_t, H)          # deterministic "random" vertical shift

    out = translate_y(x, ty)
    out = jax.block_until_ready(out)

    # pure-JAX reference check of the shift-with-zero-fill semantics
    ty_i = int(ty)
    h_idx = jnp.arange(H)
    src = h_idx - ty_i
    valid = (src >= 0) & (src < H)
    ref = jnp.where(valid[None, None, :, None],
                    x[:, :, jnp.clip(src, 0, H - 1), :], 0.0)
    assert out.shape == x.shape
    assert jnp.allclose(out, ref), "Pallas kernel mismatch vs reference"

    print("KERNEL_OK")
</pallas_src>

<mosaic_0001>
module attributes {stable_mosaic.version = 11 : i64} {
  func.func @_translate_y_kernel(%arg0: i32, %arg1: memref<1xi32, #tpu.memory_space<smem>>, %arg2: memref<8x256xf32, #tpu.memory_space<vmem>>, %arg3: memref<8x256xf32, #tpu.memory_space<vmem>>) attributes {dimension_semantics = [#tpu.dimension_semantics<parallel>], iteration_bounds = array<i64: 1>, scalar_prefetch = 1 : i64, scratch_operands = 0 : i64, tpu.core_type = #tpu.core_type<tc>, window_params = [{transform_indices = @transform_0, window_bounds = array<i64: 8, 256>}, {transform_indices = @transform_1, window_bounds = array<i64: 8, 256>}]} {
    %c0 = arith.constant 0 : index
    %0 = memref.load %arg1[%c0] : memref<1xi32, #tpu.memory_space<smem>>
    %c16_i32 = arith.constant 16 : i32
    %1 = arith.muli %0, %c16_i32 : i32
    %c256_i32 = arith.constant 256 : i32
    %2 = arith.remsi %1, %c256_i32 : i32
    %c256_i32_0 = arith.constant 256 : i32
    %3 = arith.addi %2, %c256_i32_0 : i32
    %c256_i32_1 = arith.constant 256 : i32
    %4 = arith.remsi %3, %c256_i32_1 : i32
    %c0_2 = arith.constant 0 : index
    %c0_3 = arith.constant 0 : index
    %5 = vector.load %arg2[%c0_2, %c0_3] : memref<8x256xf32, #tpu.memory_space<vmem>>, vector<8x256xf32>
    %6 = tpu.dynamic_rotate %5 by %4 dim 1 : vector<8x256xf32>, i32 -> vector<8x256xf32>
    %7 = tpu.iota {dimensions = array<i32: 1>} : vector<8x256xi32>
    %8 = vector.broadcast %1 : i32 to vector<8x256xi32>
    %9 = arith.subi %7, %8 : vector<8x256xi32>
    %c0_i32 = arith.constant 0 : i32
    %10 = vector.broadcast %c0_i32 : i32 to vector<8x256xi32>
    %11 = arith.cmpi sge, %9, %10 : vector<8x256xi32>
    %c256_i32_4 = arith.constant 256 : i32
    %12 = vector.broadcast %c256_i32_4 : i32 to vector<8x256xi32>
    %13 = arith.cmpi slt, %9, %12 : vector<8x256xi32>
    %14 = arith.andi %11, %13 : vector<8x256xi1>
    %cst = arith.constant 0.000000e+00 : f32
    %15 = vector.broadcast %cst : f32 to vector<8x256xf32>
    %16 = arith.select %14, %6, %15 : vector<8x256xi1>, vector<8x256xf32>
    %c0_5 = arith.constant 0 : index
    %c0_6 = arith.constant 0 : index
    %17 = vector.load %arg3[%c0_5, %c0_6] : memref<8x256xf32, #tpu.memory_space<vmem>>, vector<8x256xf32>
    tpu.vector_store %arg3[%c0_5, %c0_6], %16 {strides = array<i32>} : memref<8x256xf32, #tpu.memory_space<vmem>>, vector<8x256xf32>,
    return
  }
  func.func @transform_0(%arg0: i32, %arg1: memref<1xi32, #tpu.memory_space<smem>>) -> (i32, i32) {
    %c0_i32 = arith.constant 0 : i32
    %c0_i32_0 = arith.constant 0 : i32
    return %arg0, %c0_i32 : i32, i32
  }
  func.func @transform_1(%arg0: i32, %arg1: memref<1xi32, #tpu.memory_space<smem>>) -> (i32, i32) {
    %c0_i32 = arith.constant 0 : i32
    %c0_i32_0 = arith.constant 0 : i32
    return %arg0, %c0_i32 : i32, i32
  }
}

</mosaic_0001>

<bundles_post_ra>
// kernel: tpu_custom_call.1
= control target key start
LH: loop header
LB: loop body
LE: loop exit
PB: predicated region body
PF: predicated region fallthrough
CT: control target
= control target key end

     0   :  { %8 = vsyncpa [#allocation5], 0  ;;  %s184_s0 = inlined_call_operand.<no memory space> [shape: s32[1], index: 0, kind: input, shape index: {}]   ;;  %s185_s1 = inlined_call_operand.hbm [shape: f32[8,256], index: 1, kind: input, shape index: {}]   ;;  %s186_s2 = inlined_call_operand.hbm [shape: f32[8,256], index: 2, kind: output, shape index: {}]  }
   0x1   :  { %9 = vsyncpa [#allocation6], 0  ;;  %s140_s9 = smov [#allocation4]   ;;  %s92_s13 = scalar_lea.hbm %s185_s1, 256 }
   0x2   :  { %s16_s10 = sshll.u32 %s140_s9, 4  ;;  %p93_p0 = scmp.ne.s32.totalorder %s185_s1, %s92_s13  ;;  %s17_s10 = int_to_ptr.vmem [resolvable:$true] %s16_s10 }
   0x3   :  { %p96_p1 = scmp.lt.u32.totalorder %s92_s13, %s185_s1 }
   0x5   :  { %p98_p2 = pnand %p96_p1, %p93_p0 }
   0x7   :  { %101 = shalt.err (!%p98_p2)
}
   0x8   :  { %s102_s18 = scalar_lea.vmem %s17_s10, 256  ;;  %p107_p4 = scmp.lt.s32.totalorder %s17_s10, %s17_s10 }
   0x9   :  { %p103_p3 = scmp.ne.s32.totalorder %s17_s10, %s102_s18  ;;  %p108_p5 = scmp.lt.s32.totalorder %s102_s18, %s102_s18 }
   0xb   :  { %p109_p6 = por %p108_p5, %p107_p4 }
   0xd   :  { %p110_p7 = pnand %p109_p6, %p103_p3 }
   0xf   :  { %113 = shalt.err (!%p110_p7)
}
  0x10   :  { %19 = dma.hbm_to_vmem [thread:$0]  %s185_s1, 256, %s17_s10, [#allocation5]  }
  0x11   :  { %136 = dma.done.wait [#allocation5], 256  }
  0x12   :  { %137 = vsyncadd [#allocation5], 4294967040  ;;  %s87_s23 = sshll.u32 %s184_s0, 4  ;;  %v38_v0 = vld [vmem:[#allocation4] sm:$0xff]  ;;  %v39_v1 = vld [vmem:[#allocation4 + $0x8] sm:$0xff]  ;;  %v48_v2 = vlaneseq  ;;  %s141_s5 = smov [#allocation7]  }
  0x13   :  { %p25_p8 = scmp.lt.s32.totalorder %s87_s23, 0  ;;  %s26_s24 = ssub.s32 0, %s87_s23  ;;  %v59_v5 = vstv %s87_s23 }
  0x14   :  { %s88_s25 = smin.u32 %s87_s23, %s26_s24  ;;  %v49_v3 = vand.u32 127, %v48_v2  ;;  %s78_s6 = sshll.u32 %s141_s5, 4  ;;  %s79_s6 = int_to_ptr.vmem [resolvable:$true] %s78_s6 }
  0x15   :  { %s28_s26 = sand.u32 255, %s88_s25   ;;  %s114_s7 = scalar_lea.vmem %s79_s6, 256 }
  0x16   :  { %s29_s27 = ssub.s32 0, %s28_s26  ;;  %v58_v4 = vadd.s32 128, %v49_v3  ;;  %v60_v6 = vsub.s32 %v49_v3, %v59_v5  ;;  %p115_p9 = scmp.ne.s32.totalorder %s79_s6, %s114_s7 }
  0x17   :  { %s188_s27 = smov (!%p25_p8, %s29_s27), %s28_s26  ;;  %p119_p10 = scmp.lt.s32.totalorder %s79_s6, %s79_s6 }
  0x18   :  { %s31_s28 = sadd.s32 256, %s188_s27  ;;  %v61_v7 = vsub.s32 %v58_v4, %v59_v5  ;;  %vm62_vm0 = vcmp.ge.s32.totalorder %v60_v6, 0  ;;  %vm64_vm1 = vcmp.lt.s32.totalorder %v60_v6, 256  ;;  %p120_p11 = scmp.lt.s32.totalorder %s114_s7, %s114_s7 }
  0x19   :  { %s33_s29 = ssub.s32 0, %s31_s28  ;;  %vm66_vm6 = vmand %vm62_vm0, %vm64_vm1 }
  0x1a   :  { %s89_s30 = smin.u32 %s33_s29, %s31_s28  ;;  %vm63_vm2 = vcmp.ge.s32.totalorder %v61_v7, 0  ;;  %vm65_vm3 = vcmp.lt.s32.totalorder %v61_v7, 256  ;;  %p121_p12 = por %p120_p11, %p119_p10 }
  0x1b   :  { %s35_s3 = sand.u32 255, %s89_s30   ;;  %vm67_vm7 = vmand %vm63_vm2, %vm65_vm3 }
  0x1c   :  { %s41_s4 = sand.u32 127, %s35_s3   ;;  %s42_s0 = sshrl.u32 %s35_s3, 7 }
  0x1d   :  { %43 = vrot.lane.b32.xlu0 %v38_v0, %s41_s4  ;;  %s53_s1 = sand.u32 1, %s42_s0  ;;  %v47_v8 = vstv %s41_s4  ;;  %p122_p13 = pnand %p121_p12, %p115_p9 }
  0x1e   :  { %v54_v9 = vstv %s53_s1  ;;  %vm50_vm4 = vcmp.lt.s32.totalorder %v49_v3, %v47_v8 }
  0x1f   :  { %vm55_vm5 = vcmp.ne.s32.totalorder %v54_v9, 0 }
  0x21   :  { %45 = vrot.lane.b32.xlu0 %v39_v1, %s41_s4 }
  0x8f   :  { %v44_v10 = vpop.permute.xlu0 %43 }
  0x93   :  { %v46_v11 = vpop.permute.xlu0 %45 }
  0x94   :  { %v51_v12 = vsel %vm50_vm4, %v44_v10, %v46_v11  ;;  %v52_v13 = vsel %vm50_vm4, %v46_v11, %v44_v10 }
  0x95   :  { %v56_v14 = vsel %vm55_vm5, %v51_v12, %v52_v13  ;;  %v57_v15 = vsel %vm55_vm5, %v52_v13, %v51_v12 }
  0x96   :  { %v68_v16 = vsel %vm66_vm6, %v56_v14, 0.0  ;;  %v69_v17 = vsel %vm67_vm7, %v57_v15, 0.0 }
  0x97   :  { %70 = vst [vmem:[#allocation7] sm:$0xff] %v68_v16  ;;  %71 = vst [vmem:[#allocation7 + $0x8] sm:$0xff] %v69_v17 }
  0x98   :  { %125 = shalt.err (!%p122_p13)
}
  0x99   :  { %s126_s10 = scalar_lea.hbm %s186_s2, 256 }
  0x9a   :  { %p127_p0 = scmp.ne.s32.totalorder %s186_s2, %s126_s10  ;;  %p130_p1 = scmp.lt.u32.totalorder %s126_s10, %s186_s2 }
  0x9c   :  { %p132_p2 = pnand %p130_p1, %p127_p0 }
  0x9e   :  { %135 = shalt.err (!%p132_p2)
}
  0x9f   :  { %81 = dma.vmem_to_hbm [thread:$0]  %s79_s6, 256, %s186_s2, [#allocation6]  }
  0xa0   :  { %138 = dma.done.wait [#allocation6], 256  }
  0xa1   :  { %139 = vsyncadd [#allocation6], 4294967040 }
  0xa2   :  { %85 = vsyncpa [#allocation5], 1 }
  0xa3   :  { %86 = vsyncpa [#allocation6], 1 }

</bundles_post_ra>
